<compile_context>
chip_gen: v7x
topology: tpu7x:2x2x1
jax: 0.10.0
libtpu: 0.0.40
codegen_flags: <defaults>
</compile_context>

<pallas_src>
import functools

import jax
import jax.numpy as jnp
import numpy as np
from jax.experimental import pallas as pl
from jax.experimental.pallas import tpu as pltpu

LANE = 128


def ner_kernel(idx_ref, m_ref, b_ref, out_ref):
    # idx_ref: (TN, 5)      int32  token ids for this row tile
    # m_ref  : (5, V, Cp)   f32    pre-folded  emb_tbl @ W_j  (classes padded to Cp)
    # b_ref  : (1, Cp)      f32    padded bias
    # out_ref: (TN, Cp)     f32
    idx = idx_ref[...]                                  # (TN, 5)
    tn = idx.shape[0]
    n_ctx, v, cp = m_ref.shape

    # Loop-invariant vocab iota, built once and reused for all 5 slots.
    iota_v = jax.lax.broadcasted_iota(jnp.int32, (tn, v), 1)

    # Bias broadcast hoisted out of the loop.
    acc = jnp.broadcast_to(b_ref[...], (tn, cp)).astype(jnp.float32)

    # Static unroll over the 5 context positions; each matmul is
    # (TN, V) @ (V, 128) — full lane width, K = vocab.
    for j in range(n_ctx):
        onehot = (idx[:, j:j + 1] == iota_v).astype(jnp.float32)          # (TN, V)
        acc = acc + jnp.dot(onehot, m_ref[j],
                            preferred_element_type=jnp.float32)           # (TN, Cp)

    out_ref[...] = acc


@functools.partial(jax.jit, static_argnames=("tn",))
def ner_forward(idx, emb_tbl, weight, bias, *, tn=128):
    """Forward pass of NERModel.

    idx    : (N, 5)   int32   token ids
    emb_tbl: (V, E)   f32     embedding table (row 0 = padding_idx, zeroed)
    weight : (C, 5E)  f32     PyTorch linear weight
    bias   : (C,)     f32     PyTorch linear bias
    returns: (N, C)   f32
    """
    n, n_ctx = idx.shape
    v, e = emb_tbl.shape
    c = weight.shape[0]

    # ---- host-side constant folding of the static weights -------------------
    # W_j = weight.T reshaped per context slot; M[j] = emb_tbl @ W_j.
    w_slabs = weight.T.reshape(n_ctx, e, c)                     # (5, E, C)
    m = jnp.einsum("ve,jec->jvc", emb_tbl, w_slabs)             # (5, V, C)

    # Lane-dense output: pad classes to a multiple of 128 lanes.
    cp = max(LANE, ((c + LANE - 1) // LANE) * LANE)
    m = jnp.pad(m, ((0, 0), (0, 0), (0, cp - c)))               # (5, V, Cp)
    b = jnp.pad(bias, (0, cp - c)).reshape(1, cp)               # (1, Cp)

    # ---- row tiling over N ---------------------------------------------------
    tn = max(8, min(tn, ((n + 7) // 8) * 8))                    # multiple of 8
    n_pad = (-n) % tn
    idx_p = jnp.pad(idx, ((0, n_pad), (0, 0)))                  # pad rows with id 0
    np_rows = n + n_pad
    grid = (np_rows // tn,)

    # VMEM budget: resident folded weights/bias + double-buffered idx/out tiles
    # + one-hot & accumulator working set, with headroom; clamped under v7x's
    # 64 MiB physical VMEM.
    est = (m.size * 4 + b.size * 4
           + 2 * (tn * n_ctx * 4 + tn * cp * 4)
           + tn * v * 4 + tn * cp * 4)
    vmem_limit = int(min(max(est + (8 << 20), 16 << 20), 48 << 20))

    out = pl.pallas_call(
        ner_kernel,
        out_shape=jax.ShapeDtypeStruct((np_rows, cp), jnp.float32),
        grid=grid,
        in_specs=[
            pl.BlockSpec((tn, n_ctx), lambda i: (i, 0)),         # idx tile (pipelined)
            pl.BlockSpec((n_ctx, v, cp), lambda i: (0, 0, 0)),   # folded weights (resident)
            pl.BlockSpec((1, cp), lambda i: (0, 0)),             # bias (resident)
        ],
        out_specs=pl.BlockSpec((tn, cp), lambda i: (i, 0)),
        compiler_params=pltpu.CompilerParams(
            dimension_semantics=("parallel",),
            vmem_limit_bytes=vmem_limit,
        ),
    )(idx_p, m, b)

    return out[:n, :c]


if __name__ == "__main__":
    # Small, deterministic config consistent with the module.
    vocab_size = 64
    n_class = 8
    emb_size = 32
    window = 5           # forward assumes x is (N, 5)
    N = 256              # exercises the grid (two row tiles of 128)

    key = jax.random.PRNGKey(0)
    k_idx, k_emb, k_w, k_b = jax.random.split(key, 4)

    # Token ids (N, 5), including some padding (0) tokens.
    idx = jax.random.randint(k_idx, (N, window), 0, vocab_size, dtype=jnp.int32)

    # Embedding table ~ N(0,1), padding_idx=0 row zeroed (as in nn.Embedding init).
    emb_tbl = jax.random.normal(k_emb, (vocab_size, emb_size), dtype=jnp.float32)
    emb_tbl = emb_tbl.at[0].set(0.0)

    # Linear layer: PyTorch weight is (n_class, 5*emb), bias (n_class,).
    bound = 1.0 / np.sqrt(window * emb_size)
    weight = jax.random.uniform(k_w, (n_class, window * emb_size),
                                minval=-bound, maxval=bound, dtype=jnp.float32)
    bias = jax.random.uniform(k_b, (n_class,), minval=-bound, maxval=bound,
                              dtype=jnp.float32)

    out = ner_forward(idx, emb_tbl, weight, bias, tn=128)
    out = jax.block_until_ready(out)

    # Pure-JAX reference of the PyTorch forward.
    ref = emb_tbl[idx].reshape(N, window * emb_size) @ weight.T + bias
    np.testing.assert_allclose(np.asarray(out), np.asarray(ref), rtol=1e-5, atol=1e-5)

    print("KERNEL_OK")
</pallas_src>

<mosaic_0001>
module attributes {stable_mosaic.version = 11 : i64} {
  func.func @ner_kernel(%arg0: i32, %arg1: memref<128x5xi32, #tpu.memory_space<vmem>>, %arg2: memref<5x64x128xf32, #tpu.memory_space<vmem>>, %arg3: memref<1x128xf32, #tpu.memory_space<vmem>>, %arg4: memref<128x128xf32, #tpu.memory_space<vmem>>) attributes {dimension_semantics = [#tpu.dimension_semantics<parallel>], iteration_bounds = array<i64: 2>, scalar_prefetch = 0 : i64, scratch_operands = 0 : i64, tpu.core_type = #tpu.core_type<tc>, window_params = [{transform_indices = @transform_0, window_bounds = array<i64: 128, 5>}, {pipeline_mode = #tpu.pipeline_mode<synchronous>, transform_indices = @transform_1, window_bounds = array<i64: 5, 64, 128>}, {pipeline_mode = #tpu.pipeline_mode<synchronous>, transform_indices = @transform_2, window_bounds = array<i64: 1, 128>}, {transform_indices = @transform_3, window_bounds = array<i64: 128, 128>}]} {
    %c0 = arith.constant 0 : index
    %c0_0 = arith.constant 0 : index
    %0 = vector.load %arg1[%c0, %c0_0] : memref<128x5xi32, #tpu.memory_space<vmem>>, vector<128x5xi32>
    %1 = tpu.iota {dimensions = array<i32: 1>} : vector<128x64xi32>
    %c0_1 = arith.constant 0 : index
    %c0_2 = arith.constant 0 : index
    %2 = vector.load %arg3[%c0_1, %c0_2] : memref<1x128xf32, #tpu.memory_space<vmem>>, vector<1x128xf32>
    %3 = vector.shape_cast %2 : vector<1x128xf32> to vector<1x128xf32>
    %4 = vector.broadcast %3 : vector<1x128xf32> to vector<128x128xf32>
    %5 = vector.extract_strided_slice %0 {offsets = [0, 0], sizes = [128, 1], strides = [1, 1]} : vector<128x5xi32> to vector<128x1xi32>
    %6 = vector.broadcast %5 : vector<128x1xi32> to vector<128x64xi32>
    %7 = arith.cmpi eq, %6, %1 : vector<128x64xi32>
    %8 = arith.extui %7 : vector<128x64xi1> to vector<128x64xi32>
    %9 = arith.sitofp %8 : vector<128x64xi32> to vector<128x64xf32>
    %c0_3 = arith.constant 0 : index
    %c0_4 = arith.constant 0 : index
    %c0_5 = arith.constant 0 : index
    %10 = vector.load %arg2[%c0_3, %c0_4, %c0_5] : memref<5x64x128xf32, #tpu.memory_space<vmem>>, vector<1x64x128xf32>
    %11 = vector.shape_cast %10 : vector<1x64x128xf32> to vector<64x128xf32>
    %cst = arith.constant dense<0.000000e+00> : vector<128x128xf32>
    %12 = tpu.matmul %9, %11, %cst {dimension_numbers = #tpu.dot_dimension_numbers<[1], [0], [0], [1], [0, 0, 1, 1], [], []>} : vector<128x64xf32>, vector<64x128xf32>, vector<128x128xf32> -> vector<128x128xf32>
    %13 = arith.addf %4, %12 : vector<128x128xf32>
    %14 = vector.extract_strided_slice %0 {offsets = [0, 1], sizes = [128, 1], strides = [1, 1]} : vector<128x5xi32> to vector<128x1xi32>
    %15 = vector.broadcast %14 : vector<128x1xi32> to vector<128x64xi32>
    %16 = arith.cmpi eq, %15, %1 : vector<128x64xi32>
    %17 = arith.extui %16 : vector<128x64xi1> to vector<128x64xi32>
    %18 = arith.sitofp %17 : vector<128x64xi32> to vector<128x64xf32>
    %c1 = arith.constant 1 : index
    %c0_6 = arith.constant 0 : index
    %c0_7 = arith.constant 0 : index
    %19 = vector.load %arg2[%c1, %c0_6, %c0_7] : memref<5x64x128xf32, #tpu.memory_space<vmem>>, vector<1x64x128xf32>
    %20 = vector.shape_cast %19 : vector<1x64x128xf32> to vector<64x128xf32>
    %cst_8 = arith.constant dense<0.000000e+00> : vector<128x128xf32>
    %21 = tpu.matmul %18, %20, %cst_8 {dimension_numbers = #tpu.dot_dimension_numbers<[1], [0], [0], [1], [0, 0, 1, 1], [], []>} : vector<128x64xf32>, vector<64x128xf32>, vector<128x128xf32> -> vector<128x128xf32>
    %22 = arith.addf %13, %21 : vector<128x128xf32>
    %23 = vector.extract_strided_slice %0 {offsets = [0, 2], sizes = [128, 1], strides = [1, 1]} : vector<128x5xi32> to vector<128x1xi32>
    %24 = vector.broadcast %23 : vector<128x1xi32> to vector<128x64xi32>
    %25 = arith.cmpi eq, %24, %1 : vector<128x64xi32>
    %26 = arith.extui %25 : vector<128x64xi1> to vector<128x64xi32>
    %27 = arith.sitofp %26 : vector<128x64xi32> to vector<128x64xf32>
    %c2 = arith.constant 2 : index
    %c0_9 = arith.constant 0 : index
    %c0_10 = arith.constant 0 : index
    %28 = vector.load %arg2[%c2, %c0_9, %c0_10] : memref<5x64x128xf32, #tpu.memory_space<vmem>>, vector<1x64x128xf32>
    %29 = vector.shape_cast %28 : vector<1x64x128xf32> to vector<64x128xf32>
    %cst_11 = arith.constant dense<0.000000e+00> : vector<128x128xf32>
    %30 = tpu.matmul %27, %29, %cst_11 {dimension_numbers = #tpu.dot_dimension_numbers<[1], [0], [0], [1], [0, 0, 1, 1], [], []>} : vector<128x64xf32>, vector<64x128xf32>, vector<128x128xf32> -> vector<128x128xf32>
    %31 = arith.addf %22, %30 : vector<128x128xf32>
    %32 = vector.extract_strided_slice %0 {offsets = [0, 3], sizes = [128, 1], strides = [1, 1]} : vector<128x5xi32> to vector<128x1xi32>
    %33 = vector.broadcast %32 : vector<128x1xi32> to vector<128x64xi32>
    %34 = arith.cmpi eq, %33, %1 : vector<128x64xi32>
    %35 = arith.extui %34 : vector<128x64xi1> to vector<128x64xi32>
    %36 = arith.sitofp %35 : vector<128x64xi32> to vector<128x64xf32>
    %c3 = arith.constant 3 : index
    %c0_12 = arith.constant 0 : index
    %c0_13 = arith.constant 0 : index
    %37 = vector.load %arg2[%c3, %c0_12, %c0_13] : memref<5x64x128xf32, #tpu.memory_space<vmem>>, vector<1x64x128xf32>
    %38 = vector.shape_cast %37 : vector<1x64x128xf32> to vector<64x128xf32>
    %cst_14 = arith.constant dense<0.000000e+00> : vector<128x128xf32>
    %39 = tpu.matmul %36, %38, %cst_14 {dimension_numbers = #tpu.dot_dimension_numbers<[1], [0], [0], [1], [0, 0, 1, 1], [], []>} : vector<128x64xf32>, vector<64x128xf32>, vector<128x128xf32> -> vector<128x128xf32>
    %40 = arith.addf %31, %39 : vector<128x128xf32>
    %41 = vector.extract_strided_slice %0 {offsets = [0, 4], sizes = [128, 1], strides = [1, 1]} : vector<128x5xi32> to vector<128x1xi32>
    %42 = vector.broadcast %41 : vector<128x1xi32> to vector<128x64xi32>
    %43 = arith.cmpi eq, %42, %1 : vector<128x64xi32>
    %44 = arith.extui %43 : vector<128x64xi1> to vector<128x64xi32>
    %45 = arith.sitofp %44 : vector<128x64xi32> to vector<128x64xf32>
    %c4 = arith.constant 4 : index
    %c0_15 = arith.constant 0 : index
    %c0_16 = arith.constant 0 : index
    %46 = vector.load %arg2[%c4, %c0_15, %c0_16] : memref<5x64x128xf32, #tpu.memory_space<vmem>>, vector<1x64x128xf32>
    %47 = vector.shape_cast %46 : vector<1x64x128xf32> to vector<64x128xf32>
    %cst_17 = arith.constant dense<0.000000e+00> : vector<128x128xf32>
    %48 = tpu.matmul %45, %47, %cst_17 {dimension_numbers = #tpu.dot_dimension_numbers<[1], [0], [0], [1], [0, 0, 1, 1], [], []>} : vector<128x64xf32>, vector<64x128xf32>, vector<128x128xf32> -> vector<128x128xf32>
    %49 = arith.addf %40, %48 : vector<128x128xf32>
    %c0_18 = arith.constant 0 : index
    %c0_19 = arith.constant 0 : index
    %50 = vector.load %arg4[%c0_18, %c0_19] : memref<128x128xf32, #tpu.memory_space<vmem>>, vector<128x128xf32>
    tpu.vector_store %arg4[%c0_18, %c0_19], %49 {strides = array<i32>} : memref<128x128xf32, #tpu.memory_space<vmem>>, vector<128x128xf32>,
    return
  }
  func.func @transform_0(%arg0: i32) -> (i32, i32) {
    %c0_i32 = arith.constant 0 : i32
    %c0_i32_0 = arith.constant 0 : i32
    return %arg0, %c0_i32 : i32, i32
  }
  func.func @transform_1(%arg0: i32) -> (i32, i32, i32) {
    %c0_i32 = arith.constant 0 : i32
    %c0_i32_0 = arith.constant 0 : i32
    %c0_i32_1 = arith.constant 0 : i32
    %c0_i32_2 = arith.constant 0 : i32
    return %c0_i32, %c0_i32_0, %c0_i32_1 : i32, i32, i32
  }
  func.func @transform_2(%arg0: i32) -> (i32, i32) {
    %c0_i32 = arith.constant 0 : i32
    %c0_i32_0 = arith.constant 0 : i32
    %c0_i32_1 = arith.constant 0 : i32
    return %c0_i32, %c0_i32_0 : i32, i32
  }
  func.func @transform_3(%arg0: i32) -> (i32, i32) {
    %c0_i32 = arith.constant 0 : i32
    %c0_i32_0 = arith.constant 0 : i32
    return %arg0, %c0_i32 : i32, i32
  }
}

</mosaic_0001>

<bundles_post_ra>
// kernel: ner_forward.1
= control target key start
LH: loop header
LB: loop body
LE: loop exit
PB: predicated region body
PF: predicated region fallthrough
CT: control target
= control target key end

     0   :  { %s2627_s12 = smov 0   ;;  %s3273_s0 = inlined_call_operand.vmem [shape: s32[256,5], index: 0, kind: input, shape index: {}]   ;;  %s3274_s1 = inlined_call_operand.vmem [shape: f32[5,64,128], index: 1, kind: input, shape index: {}]   ;;  %s3275_s2 = inlined_call_operand.vmem [shape: f32[1,128], index: 2, kind: input, shape index: {}]   ;;  %s3276_s3 = inlined_call_operand.vmem [shape: f32[256,128], index: 3, kind: output, shape index: {}]  }
   0x1 LB: > { %s1841_s13 = sadd.s32 4294967295, %s2599_s12   ;;  %p1845_p0 = scmp.ge.s32.totalorder %s2599_s12, 1  ;;  %s2599_s12 = sphi %s2627_s12, %s13_s12  }
   0x2   : > { %p138_p1 = scmp.lt.s32.totalorder %s2599_s12, 3 }
   0x4   : > { %p139_p2 = pnand %p1845_p0, %p138_p1 }
   0x5   : > { %s1846_s14 = sshll.u32 (!%p139_p2), %s1841_s13, 4  ;;  %v1939_v0 = vld [vmem:[%s3274_s1 + $0x80] sm:$0xff] (!%p139_p2)  ;;  %v2601_v1 = vmov (!%p139_p2), 2   ;;  %v1940_v2 = vld [vmem:[%s3274_s1 + $0x88] sm:$0xff] (!%p139_p2)  ;;  %v1941_v3 = vld [vmem:[%s3274_s1 + $0x90] sm:$0xff] (!%p139_p2)  ;;  %v2602_v26 = vmov (!%p139_p2), 0   ;;  %v190_v51 = vlaneseq (!%p139_p2) }
   0x6   : > { %142 = sbr.rel (%p139_p2) target bundleno = 593 (0x251), region = 32  ;;  %2549 = vset.pattern.permute.xlu0 (!%p139_p2), %v2601_v1  ;;  %2547 = vset.pattern.permute.xlu1 (!%p139_p2), %v2601_v1  ;;  %p163_p3 = scmp.lt.s32.totalorder (!%p139_p2), %s1846_s14, 31  ;;  %v1942_v4 = vld [vmem:[%s3274_s1 + $0x98] sm:$0xff] (!%p139_p2)  ;;  %v2649_v5 = vpack.c.bf16 (!%p139_p2), %v1940_v2, %v1939_v0  ;;  %v1943_v7 = vld [vmem:[%s3274_s1 + $0xa0] sm:$0xff] (!%p139_p2)  ;;  %v1944_v8 = vld [vmem:[%s3274_s1 + $0xa8] sm:$0xff] (!%p139_p2)  ;;  %v2603_v42 = vmov (!%p139_p2), 3  }
   0x7   : > { %v2651_v6 = vpack.c.bf16 (!%p139_p2), %v1942_v4, %v1941_v3  ;;  %v295_v9 = vld [vmem:[%s3274_s1] sm:$0xff] (!%p139_p2)  ;;  %v296_v10 = vld [vmem:[%s3274_s1 + $0x8] sm:$0xff] (!%p139_p2)  ;;  %v2678_v11 = vpack.c.bf16 (!%p139_p2), %v1944_v8, %v1943_v7  ;;  %v1945_v17 = vld [vmem:[%s3274_s1 + $0xb0] sm:$0xff] (!%p139_p2)  ;;  %v2604_v44 = vmov (!%p139_p2), 1   ;;  %v2605_v50 = vmov (!%p139_p2), 4  }
   0x8   : > { %2398 = vmatprep.subr.bf16.mxu0 (!%p139_p2), %v2649_v5  ;;  %v2365_v12 = vpack.c.bf16 (!%p139_p2), %v296_v10, %v295_v9  ;;  %v1946_v18 = vld [vmem:[%s3274_s1 + $0xb8] sm:$0xff] (!%p139_p2)  ;;  %v297_v20 = vld [vmem:[%s3274_s1 + $0x10] sm:$0xff] (!%p139_p2)  ;;  %v299_v22 = vld [vmem:[%s3274_s1 + $0x20] sm:$0xff] (!%p139_p2)  ;;  %v2859_v52 = vand.u32 (!%p139_p2), 127, %v190_v51  ;;  %vm303_vm0 = vcmask (!%p139_p2), 523264   ;;  %v2606_v55 = vmov (!%p139_p2), 0.0  }
   0x9   : > { %2400 = vmatpush3.bf16.msra.mxu0 (!%p139_p2), %v2649_v5  ;;  %v2705_v19 = vpack.c.bf16 (!%p139_p2), %v1946_v18, %v1945_v17  ;;  %v298_v21 = vld [vmem:[%s3274_s1 + $0x18] sm:$0xff] (!%p139_p2)  ;;  %v300_v25 = vld [vmem:[%s3274_s1 + $0x28] sm:$0xff] (!%p139_p2)  ;;  %v301_v28 = vld [vmem:[%s3274_s1 + $0x30] sm:$0xff] (!%p139_p2) }
   0xa   : > { %2402 = vmatprep.subr.bf16.mxu0 (!%p139_p2), %v2651_v6  ;;  %2366 = vmatprep.subr.bf16.mxu1 (!%p139_p2), %v2365_v12  ;;  %v2369_v24 = vpack.c.bf16 (!%p139_p2), %v298_v21, %v297_v20  ;;  %v2373_v27 = vpack.c.bf16 (!%p139_p2), %v300_v25, %v299_v22  ;;  %v302_v29 = vld [vmem:[%s3274_s1 + $0x38] sm:$0xff] (!%p139_p2)  ;;  %v1979_v37 = vld [vmem:[%s3274_s1 + $0xc0] sm:$0xff] (!%p139_p2)  ;;  %v1980_v38 = vld [vmem:[%s3274_s1 + $0xc8] sm:$0xff] (!%p139_p2) }
   0xb   : > { %2368 = vmatpush3.bf16.msra.mxu1 (!%p139_p2), %v2365_v12  ;;  %v2377_v30 = vpack.c.bf16 (!%p139_p2), %v302_v29, %v301_v28  ;;  %v2773_v39 = vpack.c.bf16 (!%p139_p2), %v1980_v38, %v1979_v37  ;;  %v1899_v47 = vld [vmem:[%s3274_s1 + $0x40] sm:$0xff] (!%p139_p2)  ;;  %v1900_v48 = vld [vmem:[%s3274_s1 + $0x48] sm:$0xff] (!%p139_p2)  ;;  %v1981_v57 = vld [vmem:[%s3274_s1 + $0xd0] sm:$0xff] (!%p139_p2) }
   0xc   : > { %2370 = vmatprep.subr.bf16.mxu1 (!%p139_p2), %v2369_v24  ;;  %v2830_v49 = vpack.c.bf16 (!%p139_p2), %v1900_v48, %v1899_v47  ;;  %v1982_v58 = vld [vmem:[%s3274_s1 + $0xd8] sm:$0xff] (!%p139_p2)  ;;  %v1983_v0 = vld [vmem:[%s3274_s1 + $0xe0] sm:$0xff] (!%p139_p2)  ;;  %v1984_v2 = vld [vmem:[%s3274_s1 + $0xe8] sm:$0xff] (!%p139_p2) }
   0xd   : > { %s3278_s14 = smov (!%p163_p3, %s1846_s14), 31  ;;  %2404 = vmatpush3.bf16.msra.mxu0 %v2651_v6  ;;  %v2417_v62 = vpack.c.bf16 %v1982_v58, %v1981_v57  ;;  %v2421_v7 = vpack.c.bf16 %v1984_v2, %v1983_v0  ;;  %v1985_v9 = vld [vmem:[%s3274_s1 + $0xf0] sm:$0xff]  ;;  %v1986_v10 = vld [vmem:[%s3274_s1 + $0xf8] sm:$0xff]  ;;  %v2020_v25 = vld [vmem:[%s3274_s1 + $0x108] sm:$0xff] }
   0xe   : > { %s1847_s27 = sshll.u32 %s3278_s14, 3  ;;  %2406 = vmatprep.subr.bf16.mxu0 %v2678_v11  ;;  %v1901_v12 = vld [vmem:[%s3274_s1 + $0x50] sm:$0xff]  ;;  %v2425_v20 = vpack.c.bf16 %v1986_v10, %v1985_v9  ;;  %v1904_v28 = vld [vmem:[%s3274_s1 + $0x68] sm:$0xff]  ;;  %v2022_v10 = vld [vmem:[%s3274_s1 + $0x118] sm:$0xff] }
   0xf   : > { %s2675_s7 = scalar_lea.vmem %s3273_s0, %s1847_s27  ;;  %2372 = vmatpush3.bf16.msra.mxu1 %v2369_v24  ;;  %v2019_v24 = vld [vmem:[%s3274_s1 + $0x100] sm:$0xff]  ;;  %s3238_s4 = scalar_lea.vmem %s3276_s3, %s1847_s27 }
  0x10   : > { %v2681_v13 = vld [vmem:[%s2675_s7 + $0x10] sm:$0xff]  ;;  %v2684_v14 = vld [vmem:[%s2675_s7] sm:$0xff]  ;;  %v2692_v16 = vld [vmem:[%s2675_s7 + $0x8] sm:$0xff]  ;;  %2374 = vmatprep.subr.bf16.mxu1 %v2373_v27 }
  0x11   : > { %834 = vperm.xlu0 %2549, %v2681_v13   ;;  %828 = vperm.xlu1 %2547, %v2684_v14   ;;  %v2689_v15 = vld [vmem:[%s2675_s7 + $0x30] sm:$0xff]  ;;  %v2717_v23 = vld [vmem:[%s2675_s7 + $0x18] sm:$0xff]  ;;  %v2738_v31 = vld [vmem:[%s2675_s7 + $0x20] sm:$0xff] }
  0x12   : > { %2408 = vmatpush3.bf16.msra.mxu0 %v2678_v11  ;;  %v2743_v32 = vld [vmem:[%s2675_s7 + $0x28] sm:$0xff]  ;;  %v2756_v34 = vld [vmem:[%s2675_s7 + $0x38] sm:$0xff]  ;;  %v2759_v35 = vld [vmem:[%s2675_s7 + $0x50] sm:$0xff] }
  0x13   : > { %2410 = vmatprep.subr.bf16.mxu0 %v2705_v19  ;;  %2376 = vmatpush3.bf16.msra.mxu1 %v2373_v27  ;;  %v2751_v33 = vld [vmem:[%s2675_s7 + $0x48] sm:$0xff]  ;;  %v2779_v40 = vld [vmem:[%s2675_s7 + $0x70] sm:$0xff]  ;;  %v2783_v41 = vld [vmem:[%s2675_s7 + $0x40] sm:$0xff] }
  0x14   : > { %2378 = vmatprep.subr.bf16.mxu1 %v2377_v30  ;;  %v2765_v36 = vld [vmem:[%s2675_s7 + $0x68] sm:$0xff]  ;;  %v2795_v43 = vld [vmem:[%s2675_s7 + $0x58] sm:$0xff]  ;;  %v2806_v45 = vld [vmem:[%s2675_s7 + $0x60] sm:$0xff] }
  0x15   : > { %846 = vperm.xlu0 %2549, %v2689_v15   ;;  %831 = vperm.xlu1 %2547, %v2692_v16   ;;  %v2817_v46 = vld [vmem:[%s2675_s7 + $0x78] sm:$0xff]  ;;  %v1903_v27 = vld [vmem:[%s3274_s1 + $0x60] sm:$0xff] }
  0x16   : > { %2412 = vmatpush3.bf16.msra.mxu0 %v2705_v19  ;;  %v2389_v37 = vpack.c.bf16 %v1904_v28, %v1903_v27 }
  0x17   : > { %2380 = vmatpush3.bf16.msra.mxu1 %v2377_v30  ;;  %2414 = vmatprep.subr.bf16.mxu0 %v2773_v39 }
  0x18   : > { %2382 = vmatprep.subr.bf16.mxu1 %v2830_v49 }
  0x19   : > { %2554 = vset.pattern.permute.xlu0 %v2602_v26  ;;  %2548 = vset.pattern.permute.xlu1 %v2602_v26 }
  0x1a   : > { %200 = vperm.xlu0 %2554, %v2684_v14   ;;  %209 = vperm.xlu1 %2548, %v2717_v23  }
  0x1e   : > { %203 = vperm.xlu0 %2554, %v2692_v16   ;;  %2550 = vset.pattern.permute.xlu1 %v2601_v1 }
  0x1f   : > { %837 = vperm.xlu1 %2550, %v2717_v23  }
  0x22   : > { %206 = vperm.xlu0 %2554, %v2681_v13  }
  0x23   : > { %2551 = vset.pattern.permute.xlu1 %v2602_v26 }
  0x24   : > { %212 = vperm.xlu1 %2551, %v2738_v31  }
  0x26   : > { %215 = vperm.xlu0 %2554, %v2743_v32  }
  0x28   : > { %2552 = vset.pattern.permute.xlu1 %v2601_v1 }
  0x29   : > { %840 = vperm.xlu1 %2552, %v2738_v31  }
  0x2a   : > { %218 = vperm.xlu0 %2554, %v2689_v15  }
  0x2d   : > { %843 = vperm.xlu1 %2552, %v2743_v32  }
  0x2e   : > { %227 = vperm.xlu0 %2554, %v2751_v33  }
  0x31   : > { %2553 = vset.pattern.permute.xlu1 %v2602_v26 }
  0x32   : > { %221 = vperm.xlu1 %2553, %v2756_v34   ;;  %230 = vperm.xlu0 %2554, %v2759_v35  }
  0x36   : > { %2555 = vset.pattern.permute.xlu1 %v2601_v1  ;;  %239 = vperm.xlu0 %2554, %v2765_v36  }
  0x37   : > { %849 = vperm.xlu1 %2555, %v2756_v34  }
  0x3a   : > { %242 = vperm.xlu0 %2554, %v2779_v40  }
  0x3b   : > { %2556 = vset.pattern.permute.xlu1 %v2602_v26 }
  0x3c   : > { %224 = vperm.xlu1 %2556, %v2783_v41  }
  0x3e   : > { %2562 = vset.pattern.permute.xlu0 %v2603_v42 }
  0x3f   : > { %1148 = vperm.xlu0 %2562, %v2681_v13  }
  0x40   : > { %2557 = vset.pattern.permute.xlu1 %v2603_v42 }
  0x41   : > { %1142 = vperm.xlu1 %2557, %v2684_v14  }
  0x43   : > { %1160 = vperm.xlu0 %2562, %v2689_v15  }
  0x45   : > { %1145 = vperm.xlu1 %2557, %v2692_v16  }
  0x47   : > { %1172 = vperm.xlu0 %2562, %v2759_v35  }
  0x49   : > { %2558 = vset.pattern.permute.xlu1 %v2602_v26 }
  0x4a   : > { %233 = vperm.xlu1 %2558, %v2795_v43  }
  0x4b   : > { %1184 = vperm.xlu0 %2562, %v2779_v40  }
  0x4e   : > { %2559 = vset.pattern.permute.xlu1 %v2603_v42 }
  0x4f   : > { %1151 = vperm.xlu1 %2559, %v2717_v23   ;;  %2572 = vset.pattern.permute.xlu0 %v2604_v44 }
  0x50   : > { %517 = vperm.xlu0 %2572, %v2692_v16  }
  0x53   : > { %2560 = vset.pattern.permute.xlu1 %v2602_v26 }
  0x54   : > { %236 = vperm.xlu1 %2560, %v2806_v45   ;;  %520 = vperm.xlu0 %2572, %v2681_v13  }
  0x58   : > { %2561 = vset.pattern.permute.xlu1 %v2603_v42  ;;  %529 = vperm.xlu0 %2572, %v2743_v32  }
  0x59   : > { %1154 = vperm.xlu1 %2561, %v2738_v31  }
  0x5c   : > { %532 = vperm.xlu0 %2572, %v2689_v15  }
  0x5d   : > { %1157 = vperm.xlu1 %2561, %v2743_v32  }
  0x60   : > { %541 = vperm.xlu0 %2572, %v2751_v33  }
  0x61   : > { %2563 = vset.pattern.permute.xlu1 %v2602_v26 }
  0x62   : > { %245 = vperm.xlu1 %2563, %v2817_v46  }
  0x64   : > { %544 = vperm.xlu0 %2572, %v2759_v35  }
  0x66   : > { %2564 = vset.pattern.permute.xlu1 %v2603_v42 }
  0x67   : > { %1163 = vperm.xlu1 %2564, %v2756_v34  }
  0x68   : > { %553 = vperm.xlu0 %2572, %v2765_v36  }
  0x6b   : > { %2565 = vset.pattern.permute.xlu1 %v2604_v44 }
  0x6c   : > { %514 = vperm.xlu1 %2565, %v2684_v14   ;;  %556 = vperm.xlu0 %2572, %v2779_v40  }
  0x70   : > { %2566 = vset.pattern.permute.xlu1 %v2603_v42  ;;  %2580 = vset.pattern.permute.xlu0 %v2605_v50 }
  0x71   : > { %1166 = vperm.xlu1 %2566, %v2783_v41   ;;  %1462 = vperm.xlu0 %2580, %v2681_v13   ;;  %v1902_v13 = vld [vmem:[%s3274_s1 + $0x58] sm:$0xff] }
  0x72   : > { %v2385_v21 = vpack.c.bf16 %v1902_v13, %v1901_v12 }
  0x75   : > { %1169 = vperm.xlu1 %2566, %v2751_v33   ;;  %1474 = vperm.xlu0 %2580, %v2689_v15  }
  0x79   : > { %2567 = vset.pattern.permute.xlu1 %v2604_v44  ;;  %1486 = vperm.xlu0 %2580, %v2759_v35  }
  0x7a   : > { %523 = vperm.xlu1 %2567, %v2717_v23  }
  0x7d   : > { %2586 = vset.pattern.permute.xlu0 %v2601_v1 }
  0x7e   : > { %2568 = vset.pattern.permute.xlu1 %v2603_v42  ;;  %855 = vperm.xlu0 %2586, %v2751_v33  }
  0x7f   : > { %1175 = vperm.xlu1 %2568, %v2795_v43  }
  0x82   : > { %858 = vperm.xlu0 %2586, %v2759_v35  }
  0x83   : > { %2569 = vset.pattern.permute.xlu1 %v2604_v44 }
  0x84   : > { %526 = vperm.xlu1 %2569, %v2738_v31  }
  0x86   : > { %867 = vperm.xlu0 %2586, %v2765_v36  }
  0x88   : > { %2570 = vset.pattern.permute.xlu1 %v2603_v42 }
  0x89   : > { %1178 = vperm.xlu1 %2570, %v2806_v45  }
  0x8a   : > { %870 = vperm.xlu0 %2586, %v2779_v40  }
  0x8d   : > { %1181 = vperm.xlu1 %2570, %v2765_v36  }
  0x8e   : > { %2591 = vset.pattern.permute.xlu0 %v2605_v50 }
  0x8f   : > { %1498 = vperm.xlu0 %2591, %v2779_v40   ;;  %v1905_v40 = vld [vmem:[%s3274_s1 + $0x70] sm:$0xff] }
  0x90   : > { %v829_v53 = vpop.permute.xlu1 %828  ;;  %v835_v54 = vpop.permute.xlu0 %834 }
  0x91   : > { %vm875_vm1 = vcmp.eq.s32.totalorder %v829_v53, %v2859_v52  ;;  %2571 = vset.pattern.permute.xlu1 %v2604_v44  ;;  %vm877_vm2 = vcmp.eq.s32.totalorder %v835_v54, %v2859_v52 }
  0x92   : > { %535 = vperm.xlu1 %2571, %v2756_v34   ;;  %v1923_v56 = vsel %vm875_vm1, 1.0, %v2606_v55  ;;  %v1925_v61 = vsel %vm877_vm2, 1.0, %v2606_v55 }
  0x93   : > { %2261 = vmatprep.mubr.msk.f32.mxu0 %vm303_vm0, %v1923_v56 }
  0x94   : > { %v832_v59 = vpop.permute.xlu1 %831  ;;  %v2875_v60 = vpop.permute.xlu0 %846 }
  0x95   : > { %vm876_vm3 = vcmp.eq.s32.totalorder %v832_v59, %v2859_v52  ;;  %vm881_vm12 = vcmp.eq.s32.totalorder %v2875_v60, %v2859_v52 }
  0x96   : > { %v1924_v63 = vsel %vm876_vm3, 1.0, %v2606_v55  ;;  %2573 = vset.pattern.permute.xlu1 %v2603_v42  ;;  %v1906_v42 = vld [vmem:[%s3274_s1 + $0x78] sm:$0xff]  ;;  %v1929_v56 = vsel %vm881_vm12, 1.0, %v2606_v55 }
  0x97   : > { %1187 = vperm.xlu1 %2573, %v2817_v46   ;;  %2262 = vmatmul.mubr.msk.f32.vlgmr.msra.gmra.mrb[0].mxu0 %vm303_vm0, %v1924_v63  ;;  %v2393_v48 = vpack.c.bf16 %v1906_v42, %v1905_v40 }
  0x98   : > { %2264 = vmatprep.mubr.msk.f32.mxu0 %vm303_vm0, %v1925_v61  ;;  %2416 = vmatpush3.bf16.msra.mxu0 %v2773_v39 }
  0x99   : > { %v201_v3 = vpop.permute.xlu0 %200  ;;  %v210_v4 = vpop.permute.xlu1 %209  ;;  %2418 = vmatprep.subr.bf16.mxu0 %v2417_v62 }
  0x9a   : > { %vm247_vm4 = vcmp.eq.s32.totalorder %v201_v3, %v2859_v52  ;;  %vm250_vm7 = vcmp.eq.s32.totalorder %v210_v4, %v2859_v52 }
  0x9b   : > { %2574 = vset.pattern.permute.xlu1 %v2604_v44  ;;  %v1851_v8 = vsel %vm247_vm4, 1.0, %v2606_v55  ;;  %v1854_v35 = vsel %vm250_vm7, 1.0, %v2606_v55 }
  0x9c   : > { %538 = vperm.xlu1 %2574, %v2783_v41   ;;  %2181 = vmatprep.mubr.msk.f32.mxu1 %vm303_vm0, %v1851_v8 }
  0x9d   : > { %v204_v15 = vpop.permute.xlu0 %203  ;;  %2420 = vmatpush3.bf16.msra.mxu0 %v2417_v62 }
  0x9e   : > { %vm248_vm5 = vcmp.eq.s32.totalorder %v204_v15, %v2859_v52  ;;  %v838_v17 = vpop.permute.xlu1 %837  ;;  %2422 = vmatprep.subr.bf16.mxu0 %v2421_v7 }
  0x9f   : > { %v1852_v18 = vsel %vm248_vm5, 1.0, %v2606_v55  ;;  %vm878_vm6 = vcmp.eq.s32.totalorder %v838_v17, %v2859_v52  ;;  %v2023_v17 = vld [vmem:[%s3274_s1 + $0x120] sm:$0xff] }
  0xa0   : > { %v1926_v22 = vsel %vm878_vm6, 1.0, %v2606_v55  ;;  %2575 = vset.pattern.permute.xlu1 %v2605_v50  ;;  %2182 = vmatmul.mubr.msk.f32.vlgmr.msra.gmra.mrb[0].mxu1 %vm303_vm0, %v1852_v18  ;;  %v2024_v18 = vld [vmem:[%s3274_s1 + $0x128] sm:$0xff] }
  0xa1   : > { %v207_v26 = vpop.permute.xlu0 %206  ;;  %1456 = vperm.xlu1 %2575, %v2684_v14   ;;  %2265 = vmatmul.mubr.msk.f32.gmra.mrb[2].mxu0 %vm303_vm0, %v1926_v22  ;;  %v2932_v14 = vpack.c.bf16 %v2020_v25, %v2019_v24  ;;  %v2025_v22 = vld [vmem:[%s3274_s1 + $0x130] sm:$0xff]  ;;  %v2026_v24 = vld [vmem:[%s3274_s1 + $0x138] sm:$0xff] }
  0xa2   : > { %vm249_vm8 = vcmp.eq.s32.totalorder %v207_v26, %v2859_v52  ;;  %2424 = vmatpush3.bf16.msra.mxu0 %v2421_v7  ;;  %2384 = vmatpush3.bf16.msra.mxu1 %v2830_v49  ;;  %v2441_v26 = vpack.c.bf16 %v2026_v24, %v2025_v22 }
  0xa3   : > { %v1853_v29 = vsel %vm249_vm8, 1.0, %v2606_v55  ;;  %v213_v30 = vpop.permute.xlu1 %212  ;;  %2426 = vmatprep.subr.bf16.mxu0 %v2425_v20  ;;  %2386 = vmatprep.subr.bf16.mxu1 %v2385_v21 }
  0xa4   : > { %vm251_vm9 = vcmp.eq.s32.totalorder %v213_v30, %v2859_v52  ;;  %2184 = vmatprep.mubr.msk.f32.mxu1 %vm303_vm0, %v1853_v29 }
  0xa5   : > { %v1855_v38 = vsel %vm251_vm9, 1.0, %v2606_v55  ;;  %1459 = vperm.xlu1 %2575, %v2692_v16   ;;  %2185 = vmatmul.mubr.msk.f32.gmra.mrb[2].mxu1 %vm303_vm0, %v1854_v35  ;;  %v216_v39 = vpop.permute.xlu0 %215 }
  0xa6   : > { %2187 = vmatprep.mubr.msk.f32.mxu1 %vm303_vm0, %v1855_v38  ;;  %vm252_vm10 = vcmp.eq.s32.totalorder %v216_v39, %v2859_v52  ;;  %2428 = vmatpush3.bf16.msra.mxu0 %v2425_v20 }
  0xa7   : > { %v1856_v47 = vsel %vm252_vm10, 1.0, %v2606_v55  ;;  %2388 = vmatpush3.bf16.msra.mxu1 %v2385_v21  ;;  %2430 = vmatprep.subr.bf16.mxu0 %v2932_v14  ;;  %v2437_v21 = vpack.c.bf16 %v2024_v18, %v2023_v17 }
  0xa8   : > { %v841_v16 = vpop.permute.xlu1 %840  ;;  %2390 = vmatprep.subr.bf16.mxu1 %v2389_v37 }
  0xa9   : > { %vm879_vm11 = vcmp.eq.s32.totalorder %v841_v16, %v2859_v52  ;;  %2576 = vset.pattern.permute.xlu1 %v2604_v44  ;;  %v219_v49 = vpop.permute.xlu0 %218  ;;  %2188 = vmatmul.mubr.msk.f32.gmra.mrb[4].mxu1 %vm303_vm0, %v1856_v47 }
  0xaa   : > { %v1927_v51 = vsel %vm879_vm11, 1.0, %v2606_v55  ;;  %547 = vperm.xlu1 %2576, %v2795_v43   ;;  %vm253_vm13 = vcmp.eq.s32.totalorder %v219_v49, %v2859_v52 }
  0xab   : > { %2267 = vmatprep.mubr.msk.f32.mxu0 %vm303_vm0, %v1927_v51  ;;  %v1857_v53 = vsel %vm253_vm13, 1.0, %v2606_v55  ;;  %2392 = vmatpush3.bf16.msra.mxu1 %v2389_v37 }
  0xac   : > { %v844_v54 = vpop.permute.xlu1 %843  ;;  %2190 = vmatprep.mubr.msk.f32.mxu1 %vm303_vm0, %v1857_v53  ;;  %2394 = vmatprep.subr.bf16.mxu1 %v2393_v48 }
  0xad   : > { %vm880_vm14 = vcmp.eq.s32.totalorder %v844_v54, %v2859_v52  ;;  %v228_v57 = vpop.permute.xlu0 %227 }
  0xae   : > { %v1928_v58 = vsel %vm880_vm14, 1.0, %v2606_v55  ;;  %2577 = vset.pattern.permute.xlu1 %v2605_v50  ;;  %vm256_vm2 = vcmp.eq.s32.totalorder %v228_v57, %v2859_v52 }
  0xaf   : > { %1465 = vperm.xlu1 %2577, %v2717_v23   ;;  %2268 = vmatmul.mubr.msk.f32.gmra.mrb[4].mxu0 %vm303_vm0, %v1928_v58  ;;  %v1860_v3 = vsel %vm256_vm2, 1.0, %v2606_v55 }
  0xb0   : > { %2270 = vmatprep.mubr.msk.f32.mxu0 %vm303_vm0, %v1929_v56  ;;  %2396 = vmatpush3.bf16.msra.mxu1 %v2393_v48 }
  0xb1   : > { %v222_v59 = vpop.permute.xlu1 %221  ;;  %v231_v60 = vpop.permute.xlu0 %230  ;;  %2445 = vmatprep.subr.bf16.mxu1 %v2649_v5 }
  0xb2   : > { %vm254_vm15 = vcmp.eq.s32.totalorder %v222_v59, %v2859_v52  ;;  %vm257_vm3 = vcmp.eq.s32.totalorder %v231_v60, %v2859_v52 }
  0xb3   : > { %v1858_v61 = vsel %vm254_vm15, 1.0, %v2606_v55  ;;  %2578 = vset.pattern.permute.xlu1 %v2604_v44  ;;  %v1861_v7 = vsel %vm257_vm3, 1.0, %v2606_v55 }
  0xb4   : > { %550 = vperm.xlu1 %2578, %v2806_v45   ;;  %2191 = vmatmul.mubr.msk.f32.gmra.mrb[6].mxu1 %vm303_vm0, %v1858_v61 }
  0xb5   : > { %v2974_v23 = vpop.permute.xlu0 %239 }
  0xb6   : > { %v850_v62 = vpop.permute.xlu1 %849  ;;  %vm260_vm10 = vcmp.eq.s32.totalorder %v2974_v23, %v2859_v52 }
  0xb7   : > { %vm882_vm1 = vcmp.eq.s32.totalorder %v850_v62, %v2859_v52  ;;  %v1864_v30 = vsel %vm260_vm10, 1.0, %v2606_v55 }
  0xb8   : > { %v1930_v63 = vsel %vm882_vm1, 1.0, %v2606_v55  ;;  %2579 = vset.pattern.permute.xlu1 %v2605_v50 }
  0xb9   : > { %1468 = vperm.xlu1 %2579, %v2738_v31   ;;  %2271 = vmatmul.mubr.msk.f32.gmra.mrb[6].mxu0 %vm303_vm0, %v1930_v63  ;;  %v243_v0 = vpop.permute.xlu0 %242 }
  0xba   : > { %vm261_vm11 = vcmp.eq.s32.totalorder %v243_v0, %v2859_v52 }
  0xbb   : > { %v225_v2 = vpop.permute.xlu1 %224 }
  0xbc   : > { %vm255_vm4 = vcmp.eq.s32.totalorder %v225_v2, %v2859_v52 }
  0xbd   : > { %v1859_v4 = vsel %vm255_vm4, 1.0, %v2606_v55  ;;  %1471 = vperm.xlu1 %2579, %v2743_v32   ;;  %v2021_v32 = vld [vmem:[%s3274_s1 + $0x110] sm:$0xff] }
  0xbe   : > { %2193 = vmatprep.mubr.msk.f32.mxu1 %vm303_vm0, %v1859_v4  ;;  %v1149_v31 = vpop.permute.xlu0 %1148  ;;  %v2433_v13 = vpack.c.bf16 %v2022_v10, %v2021_v32 }
  0xbf   : > { %2194 = vmatmul.mubr.msk.f32.gmra.mrb[8].mxu1 %vm303_vm0, %v1860_v3  ;;  %vm1191_vm6 = vcmp.eq.s32.totalorder %v1149_v31, %v2859_v52 }
  0xc0   : > { %v1143_v8 = vpop.permute.xlu1 %1142  ;;  %2196 = vmatprep.mubr.msk.f32.mxu1 %vm303_vm0, %v1861_v7 }
  0xc1   : > { %vm1189_vm5 = vcmp.eq.s32.totalorder %v1143_v8, %v2859_v52  ;;  %2581 = vset.pattern.permute.xlu1 %v2604_v44  ;;  %v1965_v44 = vsel %vm1191_vm6, 1.0, %v2606_v55 }
  0xc2   : > { %v1963_v9 = vsel %vm1189_vm5, 1.0, %v2606_v55  ;;  %559 = vperm.xlu1 %2581, %v2817_v46   ;;  %v1161_v28 = vpop.permute.xlu0 %1160 }
  0xc3   : > { %2301 = vmatprep.mubr.msk.f32.mxu0 %vm303_vm0, %v1963_v9  ;;  %vm1195_vm14 = vcmp.eq.s32.totalorder %v1161_v28, %v2859_v52 }
  0xc4   : > { %v1146_v12 = vpop.permute.xlu1 %1145  ;;  %v1969_v40 = vsel %vm1195_vm14, 1.0, %v2606_v55 }
  0xc5   : > { %vm1190_vm7 = vcmp.eq.s32.totalorder %v1146_v12, %v2859_v52 }
  0xc6   : > { %v1964_v15 = vsel %vm1190_vm7, 1.0, %v2606_v55  ;;  %2582 = vset.pattern.permute.xlu1 %v2605_v50  ;;  %v1173_v37 = vpop.permute.xlu0 %1172 }
  0xc7   : > { %1477 = vperm.xlu1 %2582, %v2756_v34   ;;  %2302 = vmatmul.mubr.msk.f32.vlgmr.msra.gmra.mrb[0].mxu0 %vm303_vm0, %v1964_v15  ;;  %vm1199_vm7 = vcmp.eq.s32.totalorder %v1173_v37, %v2859_v52 }
  0xc8   : > { %2304 = vmatprep.mubr.msk.f32.mxu0 %vm303_vm0, %v1965_v44  ;;  %2432 = vmatpush3.bf16.msra.mxu0 %v2932_v14  ;;  %v1865_v14 = vsel %vm261_vm11, 1.0, %v2606_v55  ;;  %v1973_v59 = vsel %vm1199_vm7, 1.0, %v2606_v55 }
  0xc9   : > { %v234_v20 = vpop.permute.xlu1 %233  ;;  %2434 = vmatprep.subr.bf16.mxu0 %v2433_v13 }
  0xca   : > { %vm258_vm8 = vcmp.eq.s32.totalorder %v234_v20, %v2859_v52 }
  0xcb   : > { %v1862_v34 = vsel %vm258_vm8, 1.0, %v2606_v55  ;;  %2583 = vset.pattern.permute.xlu1 %v2601_v1 }
  0xcc   : > { %852 = vperm.xlu1 %2583, %v2783_v41   ;;  %2197 = vmatmul.mubr.msk.f32.gmra.mrb[10].mxu1 %vm303_vm0, %v1862_v34 }
  0xcd   : > { %2436 = vmatpush3.bf16.msra.mxu0 %v2433_v13 }
  0xce   : > { %v1152_v25 = vpop.permute.xlu1 %1151  ;;  %2438 = vmatprep.subr.bf16.mxu0 %v2437_v21 }
  0xcf   : > { %vm1192_vm9 = vcmp.eq.s32.totalorder %v1152_v25, %v2859_v52 }
  0xd0   : > { %v1966_v27 = vsel %vm1192_vm9, 1.0, %v2606_v55  ;;  %2584 = vset.pattern.permute.xlu1 %v2605_v50 }
  0xd1   : > { %1480 = vperm.xlu1 %2584, %v2783_v41   ;;  %2305 = vmatmul.mubr.msk.f32.gmra.mrb[2].mxu0 %vm303_vm0, %v1966_v27 }
  0xd2   : > { %2440 = vmatpush3.bf16.msra.mxu0 %v2437_v21 }
  0xd3   : > { %v237_v29 = vpop.permute.xlu1 %236  ;;  %2442 = vmatprep.subr.bf16.mxu0 %v2441_v26 }
  0xd4   : > { %vm259_vm12 = vcmp.eq.s32.totalorder %v237_v29, %v2859_v52 }
  0xd5   : > { %v1863_v35 = vsel %vm259_vm12, 1.0, %v2606_v55  ;;  %1483 = vperm.xlu1 %2584, %v2751_v33   ;;  %v3050_v33 = vpop.permute.xlu0 %1184 }
  0xd6   : > { %2199 = vmatprep.mubr.msk.f32.mxu1 %vm303_vm0, %v1863_v35  ;;  %2444 = vmatpush3.bf16.msra.mxu0 %v2441_v26 }
  0xd7   : > { %2200 = vmatmul.mubr.msk.f32.gmra.mrb[12].mxu1 %vm303_vm0, %v1864_v30 }
  0xd8   : > { %v1155_v41 = vpop.permute.xlu1 %1154  ;;  %2202 = vmatprep.mubr.msk.f32.mxu1 %vm303_vm0, %v1865_v14 }
  0xd9   : > { %vm1193_vm13 = vcmp.eq.s32.totalorder %v1155_v41, %v2859_v52  ;;  %2585 = vset.pattern.permute.xlu1 %v2601_v1  ;;  %v518_v16 = vpop.permute.xlu0 %517 }
  0xda   : > { %v1967_v38 = vsel %vm1193_vm13, 1.0, %v2606_v55  ;;  %861 = vperm.xlu1 %2585, %v2795_v43   ;;  %vm562_vm3 = vcmp.eq.s32.totalorder %v518_v16, %v2859_v52 }
  0xdb   : > { %2307 = vmatprep.mubr.msk.f32.mxu0 %vm303_vm0, %v1967_v38  ;;  %v1884_v54 = vsel %vm562_vm3, 1.0, %v2606_v55 }
  0xdc   : > { %v1158_v39 = vpop.permute.xlu1 %1157 }
  0xdd   : > { %vm1194_vm15 = vcmp.eq.s32.totalorder %v1158_v39, %v2859_v52 }
  0xde   : > { %v1968_v42 = vsel %vm1194_vm15, 1.0, %v2606_v55  ;;  %2587 = vset.pattern.permute.xlu1 %v2605_v50  ;;  %vm1203_vm15 = vcmp.eq.s32.totalorder %v3050_v33, %v2859_v52 }
  0xdf   : > { %1489 = vperm.xlu1 %2587, %v2795_v43   ;;  %2308 = vmatmul.mubr.msk.f32.gmra.mrb[4].mxu0 %vm303_vm0, %v1968_v42  ;;  %v521_v43 = vpop.permute.xlu0 %520  ;;  %v1977_v4 = vsel %vm1203_vm15, 1.0, %v2606_v55 }
  0xe0   : > { %2310 = vmatprep.mubr.msk.f32.mxu0 %vm303_vm0, %v1969_v40  ;;  %vm563_vm4 = vcmp.eq.s32.totalorder %v521_v43, %v2859_v52 }
  0xe1   : > { %v246_v47 = vpop.permute.xlu1 %245  ;;  %v1885_v57 = vsel %vm563_vm4, 1.0, %v2606_v55 }
  0xe2   : > { %vm262_vm1 = vcmp.eq.s32.totalorder %v246_v47, %v2859_v52 }
  0xe3   : > { %v1866_v48 = vsel %vm262_vm1, 1.0, %v2606_v55  ;;  %2588 = vset.pattern.permute.xlu1 %v2601_v1  ;;  %v530_v60 = vpop.permute.xlu0 %529 }
  0xe4   : > { %864 = vperm.xlu1 %2588, %v2806_v45   ;;  %2203 = vmatmul.mubr.msk.f32.gmra.mrb[14].mxu1 %vm303_vm0, %v1866_v48  ;;  %vm566_vm11 = vcmp.eq.s32.totalorder %v530_v60, %v2859_v52 }
  0xe5   : > { %v1888_v23 = vsel %vm566_vm11, 1.0, %v2606_v55 }
  0xe6   : > { %v1164_v49 = vpop.permute.xlu1 %1163 }
  0xe7   : > { %vm1196_vm2 = vcmp.eq.s32.totalorder %v1164_v49, %v2859_v52 }
  0xe8   : > { %v1970_v51 = vsel %vm1196_vm2, 1.0, %v2606_v55  ;;  %2589 = vset.pattern.permute.xlu1 %v2605_v50 }
  0xe9   : > { %1492 = vperm.xlu1 %2589, %v2806_v45   ;;  %2311 = vmatmul.mubr.msk.f32.gmra.mrb[6].mxu0 %vm303_vm0, %v1970_v51 }
  0xeb   : > { %v515_v53 = vpop.permute.xlu1 %514 }
  0xec   : > { %vm561_vm5 = vcmp.eq.s32.totalorder %v515_v53, %v2859_v52 }
  0xed   : > { %v1883_v56 = vsel %vm561_vm5, 1.0, %v2606_v55  ;;  %1495 = vperm.xlu1 %2589, %v2765_v36  }
  0xee   : > { %2221 = vmatprep.mubr.msk.f32.mxu1 %vm303_vm0, %v1883_v56 }
  0xef   : > { %2222 = vmatmul.mubr.msk.f32.vlgmr.msra.gmra.mrb[0].mxu1 %vm303_vm0, %v1884_v54 }
  0xf0   : > { %v1167_v45 = vpop.permute.xlu1 %1166  ;;  %2224 = vmatprep.mubr.msk.f32.mxu1 %vm303_vm0, %v1885_v57  ;;  %2449 = vmatpush3.bf16.msra.mxu1 %v2649_v5 }
  0xf1   : > { %vm1197_vm6 = vcmp.eq.s32.totalorder %v1167_v45, %v2859_v52  ;;  %2590 = vset.pattern.permute.xlu1 %v2601_v1  ;;  %2446 = vmatprep.subr.bf16.mxu1 %v2651_v6 }
  0xf2   : > { %v1971_v36 = vsel %vm1197_vm6, 1.0, %v2606_v55  ;;  %873 = vperm.xlu1 %2590, %v2817_v46  }
  0xf3   : > { %2313 = vmatprep.mubr.msk.f32.mxu0 %vm303_vm0, %v1971_v36 }
  0xf4   : > { %v1170_v58 = vpop.permute.xlu1 %1169  ;;  %2450 = vmatpush3.bf16.msra.mxu1 %v2651_v6 }
  0xf5   : > { %vm1198_vm8 = vcmp.eq.s32.totalorder %v1170_v58, %v2859_v52  ;;  %2447 = vmatprep.subr.bf16.mxu1 %v2678_v11 }
  0xf6   : > { %v1972_v1 = vsel %vm1198_vm8, 1.0, %v2606_v55  ;;  %2592 = vset.pattern.permute.xlu1 %v2605_v50 }
  0xf7   : > { %1501 = vperm.xlu1 %2592, %v2817_v46   ;;  %2314 = vmatmul.mubr.msk.f32.gmra.mrb[8].mxu0 %vm303_vm0, %v1972_v1  ;;  %v533_v46 = vpop.permute.xlu0 %532 }
  0xf8   : > { %2316 = vmatprep.mubr.msk.f32.mxu0 %vm303_vm0, %v1973_v59  ;;  %2451 = vmatpush3.bf16.msra.mxu1 %v2678_v11  ;;  %vm567_vm12 = vcmp.eq.s32.totalorder %v533_v46, %v2859_v52 }
  0xf9   : > { %v524_v5 = vpop.permute.xlu1 %523  ;;  %2448 = vmatprep.subr.bf16.mxu1 %v2705_v19 }
  0xfa   : > { %vm564_vm9 = vcmp.eq.s32.totalorder %v524_v5, %v2859_v52 }
  0xfb   : > { %v1886_v6 = vsel %vm564_vm9, 1.0, %v2606_v55  ;;  %v542_v63 = vpop.permute.xlu0 %541 }
  0xfc   : > { %2225 = vmatmul.mubr.msk.f32.gmra.mrb[2].mxu1 %vm303_vm0, %v1886_v6  ;;  %vm570_vm4 = vcmp.eq.s32.totalorder %v542_v63, %v2859_v52 }
  0xfd   : > { %2452 = vmatpush3.bf16.msra.mxu1 %v2705_v19  ;;  %v1889_v19 = vsel %vm567_vm12, 1.0, %v2606_v55  ;;  %v1892_v15 = vsel %vm570_vm4, 1.0, %v2606_v55 }
  0xfe   : > { %v1176_v50 = vpop.permute.xlu1 %1175 }
  0xff   : > { %vm1200_vm10 = vcmp.eq.s32.totalorder %v1176_v50, %v2859_v52  ;;  %v545_v7 = vpop.permute.xlu0 %544 }
 0x100   : > { %v1974_v61 = vsel %vm1200_vm10, 1.0, %v2606_v55  ;;  %vm571_vm5 = vcmp.eq.s32.totalorder %v545_v7, %v2859_v52 }
 0x101   : > { %2317 = vmatmul.mubr.msk.f32.gmra.mrb[10].mxu0 %vm303_vm0, %v1974_v61  ;;  %v1893_v18 = vsel %vm571_vm5, 1.0, %v2606_v55 }
 0x103   : > { %v527_v11 = vpop.permute.xlu1 %526  ;;  %v554_v32 = vpop.permute.xlu0 %553 }
 0x104   : > { %vm565_vm13 = vcmp.eq.s32.totalorder %v527_v11, %v2859_v52  ;;  %vm574_vm12 = vcmp.eq.s32.totalorder %v554_v32, %v2859_v52 }
 0x105   : > { %v1887_v62 = vsel %vm565_vm13, 1.0, %v2606_v55  ;;  %v1896_v14 = vsel %vm574_vm12, 1.0, %v2606_v55 }
 0x106   : > { %2227 = vmatprep.mubr.msk.f32.mxu1 %vm303_vm0, %v1887_v62 }
 0x107   : > { %2228 = vmatmul.mubr.msk.f32.gmra.mrb[4].mxu1 %vm303_vm0, %v1888_v23  ;;  %v557_v44 = vpop.permute.xlu0 %556 }
 0x108   : > { %v1179_v0 = vpop.permute.xlu1 %1178  ;;  %2230 = vmatprep.mubr.msk.f32.mxu1 %vm303_vm0, %v1889_v19  ;;  %vm575_vm13 = vcmp.eq.s32.totalorder %v557_v44, %v2859_v52 }
 0x109   : > { %vm1201_vm14 = vcmp.eq.s32.totalorder %v1179_v0, %v2859_v52  ;;  %v1897_v35 = vsel %vm575_vm13, 1.0, %v2606_v55 }
 0x10a   : > { %v1975_v2 = vsel %vm1201_vm14, 1.0, %v2606_v55 }
 0x10b   : > { %2319 = vmatprep.mubr.msk.f32.mxu0 %vm303_vm0, %v1975_v2  ;;  %v1463_v20 = vpop.permute.xlu0 %1462 }
 0x10c   : > { %v1182_v3 = vpop.permute.xlu1 %1181  ;;  %vm1505_vm8 = vcmp.eq.s32.totalorder %v1463_v20, %v2859_v52 }
 0x10d   : > { %vm1202_vm1 = vcmp.eq.s32.totalorder %v1182_v3, %v2859_v52  ;;  %v2005_v24 = vsel %vm1505_vm8, 1.0, %v2606_v55 }
 0x10e   : > { %v1976_v31 = vsel %vm1202_vm1, 1.0, %v2606_v55 }
 0x10f   : > { %2320 = vmatmul.mubr.msk.f32.gmra.mrb[12].mxu0 %vm303_vm0, %v1976_v31  ;;  %v1475_v41 = vpop.permute.xlu0 %1474 }
 0x110   : > { %2322 = vmatprep.mubr.msk.f32.mxu0 %vm303_vm0, %v1977_v4  ;;  %vm1509_vm1 = vcmp.eq.s32.totalorder %v1475_v41, %v2859_v52 }
 0x111   : > { %v536_v8 = vpop.permute.xlu1 %535  ;;  %v2009_v40 = vsel %vm1509_vm1, 1.0, %v2606_v55 }
 0x112   : > { %vm568_vm2 = vcmp.eq.s32.totalorder %v536_v8, %v2859_v52 }
 0x113   : > { %v1890_v9 = vsel %vm568_vm2, 1.0, %v2606_v55  ;;  %v1487_v42 = vpop.permute.xlu0 %1486 }
 0x114   : > { %2231 = vmatmul.mubr.msk.f32.gmra.mrb[6].mxu1 %vm303_vm0, %v1890_v9 }
 0x116   : > { %v1188_v10 = vpop.permute.xlu1 %1187 }
 0x117   : > { %vm1204_vm3 = vcmp.eq.s32.totalorder %v1188_v10, %v2859_v52  ;;  %v856_v49 = vpop.permute.xlu0 %855 }
 0x118   : > { %v1978_v12 = vsel %vm1204_vm3, 1.0, %v2606_v55  ;;  %vm884_vm5 = vcmp.eq.s32.totalorder %v856_v49, %v2859_v52 }
 0x119   : > { %2323 = vmatmul.mubr.msk.f32.gmra.mrb[14].mxu0 %vm303_vm0, %v1978_v12  ;;  %v1932_v56 = vsel %vm884_vm5, 1.0, %v2606_v55 }
 0x11b   : > { %v539_v13 = vpop.permute.xlu1 %538  ;;  %v859_v51 = vpop.permute.xlu0 %858 }
 0x11c   : > { %vm569_vm6 = vcmp.eq.s32.totalorder %v539_v13, %v2859_v52 }
 0x11d   : > { %v1891_v17 = vsel %vm569_vm6, 1.0, %v2606_v55  ;;  %vm885_vm6 = vcmp.eq.s32.totalorder %v859_v51, %v2859_v52 }
 0x11e   : > { %2233 = vmatprep.mubr.msk.f32.mxu1 %vm303_vm0, %v1891_v17  ;;  %v1933_v45 = vsel %vm885_vm6, 1.0, %v2606_v55 }
 0x11f   : > { %2234 = vmatmul.mubr.msk.f32.gmra.mrb[8].mxu1 %vm303_vm0, %v1892_v15  ;;  %v868_v60 = vpop.permute.xlu0 %867 }
 0x120   : > { %v1457_v21 = vpop.permute.xlu1 %1456  ;;  %2236 = vmatprep.mubr.msk.f32.mxu1 %vm303_vm0, %v1893_v18  ;;  %vm888_vm13 = vcmp.eq.s32.totalorder %v868_v60, %v2859_v52 }
 0x121   : > { %vm1503_vm7 = vcmp.eq.s32.totalorder %v1457_v21, %v2859_v52  ;;  %v1936_v62 = vsel %vm888_vm13, 1.0, %v2606_v55 }
 0x122   : > { %v2003_v34 = vsel %vm1503_vm7, 1.0, %v2606_v55 }
 0x123   : > { %2341 = vmatprep.mubr.msk.f32.mxu0 %vm303_vm0, %v2003_v34  ;;  %v871_v61 = vpop.permute.xlu0 %870  ;;  %v3229_v34 = vld [vmem:[%s3275_s2] ss:$0 sm:$0xff] }
 0x124   : > { %v1460_v22 = vpop.permute.xlu1 %1459 }
 0x125   : > { %vm1504_vm9 = vcmp.eq.s32.totalorder %v1460_v22, %v2859_v52 }
 0x126   : > { %v2004_v25 = vsel %vm1504_vm9, 1.0, %v2606_v55  ;;  %vm1513_vm9 = vcmp.eq.s32.totalorder %v1487_v42, %v2859_v52 }
 0x127   : > { %2342 = vmatmul.mubr.msk.f32.vlgmr.msra.gmra.mrb[0].mxu0 %vm303_vm0, %v2004_v25  ;;  %v2013_v1 = vsel %vm1513_vm9, 1.0, %v2606_v55  ;;  %v1499_v0 = vpop.permute.xlu0 %1498 }
 0x128   : > { %2344 = vmatprep.mubr.msk.f32.mxu0 %vm303_vm0, %v2005_v24 }
 0x129   : > { %v548_v26 = vpop.permute.xlu1 %547 }
 0x12a   : > { %vm572_vm10 = vcmp.eq.s32.totalorder %v548_v26, %v2859_v52 }
 0x12b   : > { %v1894_v27 = vsel %vm572_vm10, 1.0, %v2606_v55 }
 0x12c   : > { %2237 = vmatmul.mubr.msk.f32.gmra.mrb[10].mxu1 %vm303_vm0, %v1894_v27 }
 0x12e   : > { %v1466_v28 = vpop.permute.xlu1 %1465 }
 0x12f   : > { %vm1506_vm11 = vcmp.eq.s32.totalorder %v1466_v28, %v2859_v52 }
 0x130   : > { %v2006_v29 = vsel %vm1506_vm11, 1.0, %v2606_v55 }
 0x131   : > { %2345 = vmatmul.mubr.msk.f32.gmra.mrb[2].mxu0 %vm303_vm0, %v2006_v29 }
 0x133   : > { %v551_v30 = vpop.permute.xlu1 %550 }
 0x134   : > { %vm573_vm14 = vcmp.eq.s32.totalorder %v551_v30, %v2859_v52 }
 0x135   : > { %v1895_v37 = vsel %vm573_vm14, 1.0, %v2606_v55  ;;  %vm889_vm14 = vcmp.eq.s32.totalorder %v871_v61, %v2859_v52 }
 0x136   : > { %2239 = vmatprep.mubr.msk.f32.mxu1 %vm303_vm0, %v1895_v37  ;;  %v1937_v63 = vsel %vm889_vm14, 1.0, %v2606_v55 }
 0x137   : > { %2240 = vmatmul.mubr.msk.f32.gmra.mrb[12].mxu1 %vm303_vm0, %v1896_v14 }
 0x138   : > { %v1469_v38 = vpop.permute.xlu1 %1468  ;;  %2242 = vmatprep.mubr.msk.f32.mxu1 %vm303_vm0, %v1897_v35 }
 0x139   : > { %vm1507_vm15 = vcmp.eq.s32.totalorder %v1469_v38, %v2859_v52 }
 0x13a   : > { %v2007_v33 = vsel %vm1507_vm15, 1.0, %v2606_v55 }
 0x13b   : > { %2347 = vmatprep.mubr.msk.f32.mxu0 %vm303_vm0, %v2007_v33 }
 0x13c   : > { %v1472_v39 = vpop.permute.xlu1 %1471 }
 0x13d   : > { %vm1508_vm2 = vcmp.eq.s32.totalorder %v1472_v39, %v2859_v52 }
 0x13e   : > { %v2008_v47 = vsel %vm1508_vm2, 1.0, %v2606_v55  ;;  %vm1517_vm2 = vcmp.eq.s32.totalorder %v1499_v0, %v2859_v52 }
 0x13f   : > { %2348 = vmatmul.mubr.msk.f32.gmra.mrb[4].mxu0 %vm303_vm0, %v2008_v47  ;;  %v2017_v7 = vsel %vm1517_vm2, 1.0, %v2606_v55 }
 0x140   : > { %2350 = vmatprep.mubr.msk.f32.mxu0 %vm303_vm0, %v2009_v40 }
 0x141   : > { %v560_v16 = vpop.permute.xlu1 %559 }
 0x142   : > { %vm576_vm3 = vcmp.eq.s32.totalorder %v560_v16, %v2859_v52 }
 0x143   : > { %v1898_v48 = vsel %vm576_vm3, 1.0, %v2606_v55 }
 0x144   : > { %2243 = vmatmul.mubr.msk.f32.gmra.mrb[14].mxu1 %vm303_vm0, %v1898_v48 }
 0x146   : > { %v1478_v43 = vpop.permute.xlu1 %1477 }
 0x147   : > { %vm1510_vm4 = vcmp.eq.s32.totalorder %v1478_v43, %v2859_v52 }
 0x148   : > { %v2010_v53 = vsel %vm1510_vm4, 1.0, %v2606_v55 }
 0x149   : > { %2351 = vmatmul.mubr.msk.f32.gmra.mrb[6].mxu0 %vm303_vm0, %v2010_v53 }
 0x14b   : > { %v853_v54 = vpop.permute.xlu1 %852 }
 0x14c   : > { %vm883_vm7 = vcmp.eq.s32.totalorder %v853_v54, %v2859_v52 }
 0x14d   : > { %v1931_v57 = vsel %vm883_vm7, 1.0, %v2606_v55 }
 0x14e   : > { %2273 = vmatprep.mubr.msk.f32.mxu1 %vm303_vm0, %v1931_v57 }
 0x14f   : > { %2274 = vmatmul.mubr.msk.f32.vlgmr.msra.gmra.mrb[8].mxu1 %vm303_vm0, %v1932_v56 }
 0x150   : > { %v1481_v36 = vpop.permute.xlu1 %1480  ;;  %2276 = vmatprep.mubr.msk.f32.mxu1 %vm303_vm0, %v1933_v45 }
 0x151   : > { %vm1511_vm8 = vcmp.eq.s32.totalorder %v1481_v36, %v2859_v52 }
 0x152   : > { %v2011_v58 = vsel %vm1511_vm8, 1.0, %v2606_v55 }
 0x153   : > { %2353 = vmatprep.mubr.msk.f32.mxu0 %vm303_vm0, %v2011_v58 }
 0x154   : > { %v1484_v59 = vpop.permute.xlu1 %1483 }
 0x155   : > { %vm1512_vm10 = vcmp.eq.s32.totalorder %v1484_v59, %v2859_v52 }
 0x156   : > { %v2012_v5 = vsel %vm1512_vm10, 1.0, %v2606_v55 }
 0x157   : > { %2354 = vmatmul.mubr.msk.f32.gmra.mrb[8].mxu0 %vm303_vm0, %v2012_v5 }
 0x158   : > { %2356 = vmatprep.mubr.msk.f32.mxu0 %vm303_vm0, %v2013_v1 }
 0x159   : > { %v862_v6 = vpop.permute.xlu1 %861 }
 0x15a   : > { %vm886_vm11 = vcmp.eq.s32.totalorder %v862_v6, %v2859_v52 }
 0x15b   : > { %v1934_v50 = vsel %vm886_vm11, 1.0, %v2606_v55 }
 0x15c   : > { %2277 = vmatmul.mubr.msk.f32.gmra.mrb[10].mxu1 %vm303_vm0, %v1934_v50 }
 0x15e   : > { %v1490_v46 = vpop.permute.xlu1 %1489 }
 0x15f   : > { %vm1514_vm12 = vcmp.eq.s32.totalorder %v1490_v46, %v2859_v52 }
 0x160   : > { %v2014_v11 = vsel %vm1514_vm12, 1.0, %v2606_v55 }
 0x161   : > { %2357 = vmatmul.mubr.msk.f32.gmra.mrb[10].mxu0 %vm303_vm0, %v2014_v11 }
 0x163   : > { %v865_v23 = vpop.permute.xlu1 %864 }
 0x164   : > { %vm887_vm15 = vcmp.eq.s32.totalorder %v865_v23, %v2859_v52 }
 0x165   : > { %v1935_v19 = vsel %vm887_vm15, 1.0, %v2606_v55 }
 0x166   : > { %2279 = vmatprep.mubr.msk.f32.mxu1 %vm303_vm0, %v1935_v19 }
 0x167   : > { %2280 = vmatmul.mubr.msk.f32.gmra.mrb[12].mxu1 %vm303_vm0, %v1936_v62 }
 0x168   : > { %2282 = vmatprep.mubr.msk.f32.mxu1 %vm303_vm0, %v1937_v63  ;;  %v1493_v2 = vpop.permute.xlu1 %1492 }
 0x169   : > { %vm1515_vm1 = vcmp.eq.s32.totalorder %v1493_v2, %v2859_v52 }
 0x16a   : > { %v2015_v3 = vsel %vm1515_vm1, 1.0, %v2606_v55 }
 0x16b   : > { %2359 = vmatprep.mubr.msk.f32.mxu0 %vm303_vm0, %v2015_v3 }
 0x16c   : > { %v1496_v4 = vpop.permute.xlu1 %1495 }
 0x16d   : > { %vm1516_vm3 = vcmp.eq.s32.totalorder %v1496_v4, %v2859_v52 }
 0x16e   : > { %v2016_v31 = vsel %vm1516_vm3, 1.0, %v2606_v55 }
 0x16f   : > { %2360 = vmatmul.mubr.msk.f32.gmra.mrb[12].mxu0 %vm303_vm0, %v2016_v31 }
 0x170   : > { %2362 = vmatprep.mubr.msk.f32.mxu0 %vm303_vm0, %v2017_v7 }
 0x171   : > { %v874_v8 = vpop.permute.xlu1 %873 }
 0x172   : > { %vm890_vm4 = vcmp.eq.s32.totalorder %v874_v8, %v2859_v52 }
 0x173   : > { %v1938_v9 = vsel %vm890_vm4, 1.0, %v2606_v55 }
 0x174   : > { %2283 = vmatmul.mubr.msk.f32.gmra.mrb[14].mxu1 %vm303_vm0, %v1938_v9 }
 0x176   : > { %v1502_v32 = vpop.permute.xlu1 %1501 }
 0x177   : > { %vm1518_vm5 = vcmp.eq.s32.totalorder %v1502_v32, %v2859_v52 }
 0x178   : > { %v2018_v10 = vsel %vm1518_vm5, 1.0, %v2606_v55 }
 0x179   : > { %2363 = vmatmul.mubr.msk.f32.gmra.mrb[14].mxu0 %vm303_vm0, %v2018_v10 }
 0x1c2   : > { %v2223_v12 = vpop.f32.mrb[0].mxu1 }
 0x1c3   : > { %v732_v44 = vpop.f32.mrb[1].mxu1  ;;  %v2453_v22 = vadd.f32 %v2223_v12, %v3229_v34 }
 0x1c4   : > { %v2455_v52 = vadd.f32 %v3229_v34, %v732_v44 }
 0x1cf   : > { %v2226_v13 = vpop.f32.mrb[2].mxu1 }
 0x1d0   : > { %v742_v15 = vpop.f32.mrb[3].mxu1  ;;  %v2457_v27 = vadd.f32 %v2226_v13, %v3229_v34 }
 0x1d1   : > { %v2459_v28 = vadd.f32 %v3229_v34, %v742_v15 }
 0x1da   : > { %v2229_v17 = vpop.f32.mrb[4].mxu1 }
 0x1db   : > { %v752_v18 = vpop.f32.mrb[5].mxu1  ;;  %v2461_v37 = vadd.f32 %v2229_v17, %v3229_v34 }
 0x1dc   : > { %v2463_v41 = vadd.f32 %v3229_v34, %v752_v18 }
 0x1e7   : > { %v2232_v20 = vpop.f32.mrb[6].mxu1 }
 0x1e8   : > { %v762_v21 = vpop.f32.mrb[7].mxu1  ;;  %v2465_v42 = vadd.f32 %v2232_v20, %v3229_v34 }
 0x1e9   : > { %v2467_v47 = vadd.f32 %v3229_v34, %v762_v21 }
 0x1fa   : > { %v2343_v55 = vpop.f32.mrb[0].mxu0 }
 0x1fb   : > { %v2454_v24 = vadd.f32 %v2453_v22, %v2343_v55  ;;  %v1674_v25 = vpop.f32.mrb[1].mxu0 }
 0x1fc   : > { %v2456_v26 = vadd.f32 %v2455_v52, %v1674_v25 }
 0x1fd   : > { %1770 = vst [vmem:[%s3238_s4 + $0x8] sm:$0xff] %v2454_v24 }
 0x1fe   : > { %1769 = vst [vmem:[%s3238_s4] sm:$0xff] %v2456_v26 }
 0x204   : > { %v2346_v29 = vpop.f32.mrb[2].mxu0 }
 0x205   : > { %v2458_v30 = vadd.f32 %v2457_v27, %v2346_v29  ;;  %v1684_v14 = vpop.f32.mrb[3].mxu0 }
 0x206   : > { %v2460_v35 = vadd.f32 %v2459_v28, %v1684_v14 }
 0x207   : > { %1772 = vst [vmem:[%s3238_s4 + $0x18] sm:$0xff] %v2458_v30 }
 0x208   : > { %1771 = vst [vmem:[%s3238_s4 + $0x10] sm:$0xff] %v2460_v35 }
 0x212   : > { %v2349_v38 = vpop.f32.mrb[4].mxu0 }
 0x213   : > { %v2462_v33 = vadd.f32 %v2461_v37, %v2349_v38  ;;  %v1694_v39 = vpop.f32.mrb[5].mxu0 }
 0x214   : > { %v2464_v40 = vadd.f32 %v2463_v41, %v1694_v39 }
 0x215   : > { %1774 = vst [vmem:[%s3238_s4 + $0x28] sm:$0xff] %v2462_v33 }
 0x216   : > { %1773 = vst [vmem:[%s3238_s4 + $0x20] sm:$0xff] %v2464_v40 }
 0x21c   : > { %v2352_v16 = vpop.f32.mrb[6].mxu0 }
 0x21d   : > { %v2466_v48 = vadd.f32 %v2465_v42, %v2352_v16  ;;  %v1704_v49 = vpop.f32.mrb[7].mxu0 }
 0x21e   : > { %v2468_v43 = vadd.f32 %v2467_v47, %v1704_v49 }
 0x21f   : > { %1776 = vst [vmem:[%s3238_s4 + $0x38] sm:$0xff] %v2466_v48 }
 0x220   : > { %1775 = vst [vmem:[%s3238_s4 + $0x30] sm:$0xff] %v2468_v43 }
 0x222   : > { %v2275_v51 = vpop.f32.mrb[8].mxu1 }
 0x223   : > { %v1086_v53 = vpop.f32.mrb[9].mxu1  ;;  %v2469_v54 = vadd.f32 %v2275_v51, %v3229_v34 }
 0x224   : > { %v2471_v56 = vadd.f32 %v3229_v34, %v1086_v53 }
 0x22a   : > { %v2355_v57 = vpop.f32.mrb[8].mxu0 }
 0x22b   : > { %v2470_v45 = vadd.f32 %v2469_v54, %v2355_v57  ;;  %v1714_v36 = vpop.f32.mrb[9].mxu0 }
 0x22c   : > { %v2472_v58 = vadd.f32 %v2471_v56, %v1714_v36 }
 0x22d   : > { %1778 = vst [vmem:[%s3238_s4 + $0x48] sm:$0xff] %v2470_v45 }
 0x22e   : > { %1777 = vst [vmem:[%s3238_s4 + $0x40] sm:$0xff] %v2472_v58 }
 0x22f   : > { %v2278_v59 = vpop.f32.mrb[10].mxu1 }
 0x230   : > { %v1096_v1 = vpop.f32.mrb[11].mxu1  ;;  %v2473_v5 = vadd.f32 %v2278_v59, %v3229_v34 }
 0x231   : > { %v2475_v6 = vadd.f32 %v3229_v34, %v1096_v1 }
 0x234   : > { %v2358_v60 = vpop.f32.mrb[10].mxu0 }
 0x235   : > { %v2474_v50 = vadd.f32 %v2473_v5, %v2358_v60  ;;  %v1724_v46 = vpop.f32.mrb[11].mxu0 }
 0x236   : > { %v2476_v61 = vadd.f32 %v2475_v6, %v1724_v46 }
 0x237   : > { %1780 = vst [vmem:[%s3238_s4 + $0x58] sm:$0xff] %v2474_v50 }
 0x238   : > { %1779 = vst [vmem:[%s3238_s4 + $0x50] sm:$0xff] %v2476_v61 }
 0x23a   : > { %v2281_v11 = vpop.f32.mrb[12].mxu1 }
 0x23b   : > { %v1106_v23 = vpop.f32.mrb[13].mxu1  ;;  %v2477_v62 = vadd.f32 %v2281_v11, %v3229_v34 }
 0x23c   : > { %v2479_v19 = vadd.f32 %v3229_v34, %v1106_v23 }
 0x242   : > { %v2361_v63 = vpop.f32.mrb[12].mxu0 }
 0x243   : > { %v2478_v0 = vadd.f32 %v2477_v62, %v2361_v63  ;;  %v1734_v2 = vpop.f32.mrb[13].mxu0 }
 0x244   : > { %v2480_v3 = vadd.f32 %v2479_v19, %v1734_v2 }
 0x245   : > { %1782 = vst [vmem:[%s3238_s4 + $0x68] sm:$0xff] %v2478_v0 }
 0x246   : > { %1781 = vst [vmem:[%s3238_s4 + $0x60] sm:$0xff] %v2480_v3 }
 0x247   : > { %v2284_v4 = vpop.f32.mrb[14].mxu1 }
 0x248   : > { %v1116_v7 = vpop.f32.mrb[15].mxu1  ;;  %v2481_v31 = vadd.f32 %v2284_v4, %v3229_v34 }
 0x249   : > { %v2483_v8 = vadd.f32 %v3229_v34, %v1116_v7 }
 0x24c   : > { %v2364_v9 = vpop.f32.mrb[14].mxu0 }
 0x24d   : > { %v2482_v32 = vadd.f32 %v2481_v31, %v2364_v9  ;;  %v1744_v10 = vpop.f32.mrb[15].mxu0 }
 0x24e   : > { %v2484_v12 = vadd.f32 %v2483_v8, %v1744_v10 }
 0x24f   : > { %1784 = vst [vmem:[%s3238_s4 + $0x78] sm:$0xff] %v2482_v32 }
 0x250   : > { %1783 = vst [vmem:[%s3238_s4 + $0x70] sm:$0xff] %v2484_v12 }
 0x251 PF: > { %s13_s12 = sadd.s32 1, %s2599_s12  }
 0x252   : > { %p10_p4 = scmp.ge.s32.totalorder %s13_s12, 4  }
 0x254   :  { %12 = sbr.rel (!%p10_p4) target bundleno = 1 (0x1), region = 66 }

</bundles_post_ra>
